<compile_context>
chip_gen: v7x
topology: tpu7x:2x2x1
jax: 0.10.0
libtpu: 0.0.40
codegen_flags: <defaults>
</compile_context>

<pallas_src>
import functools

import jax
import jax.numpy as jnp
from jax.experimental import pallas as pl
from jax.experimental.pallas import tpu as pltpu


def _round_up(n, m):
    return ((n + m - 1) // m) * m


def sae_kernel(x_ref,
               w1_ref, b1_ref,
               w2_ref, b2_ref,
               w3_ref, b3_ref,
               w4_ref, b4_ref,
               out_ref):
    # x_ref: (TB, M_pad) batch tile; weights/biases are VMEM-resident full arrays.
    x = x_ref[...]
    h1 = jax.nn.sigmoid(
        jnp.dot(x, w1_ref[...], preferred_element_type=jnp.float32) + b1_ref[...])
    h2 = jax.nn.sigmoid(
        jnp.dot(h1, w2_ref[...], preferred_element_type=jnp.float32) + b2_ref[...])
    h3 = jax.nn.sigmoid(
        jnp.dot(h2, w3_ref[...], preferred_element_type=jnp.float32) + b3_ref[...])
    y = jnp.dot(h3, w4_ref[...], preferred_element_type=jnp.float32) + b4_ref[...]
    out_ref[...] = y.astype(out_ref.dtype)


def _pad2d(a, rows, cols):
    return jnp.zeros((rows, cols), jnp.float32).at[:a.shape[0], :a.shape[1]].set(a)


@functools.partial(jax.jit, static_argnames=("block_batch",))
def sae_forward(x, params, *, block_batch=512):
    """x: (B, nb_movies) float32.
    params: weights stored as (in_features, out_features), biases as (1, out_features).
    """
    B, nb_movies = x.shape

    M = _round_up(nb_movies, 128)     # padded movies / lane axis
    H = 128                           # padded hidden width (covers 20 and 10)

    # Batch tile: multiple of 8 (f32 sublane), capped for VMEM (conservative for v7x).
    TB = min(_round_up(B, 8), _round_up(block_batch, 8))
    Bp = _round_up(B, TB)

    # Zero-pad input and parameters to lane-dense shapes.
    xp = jnp.zeros((Bp, M), jnp.float32).at[:B, :nb_movies].set(x)
    w1 = _pad2d(params["w1"], M, H)
    b1 = _pad2d(params["b1"], 1, H)
    w2 = _pad2d(params["w2"], H, H)
    b2 = _pad2d(params["b2"], 1, H)
    w3 = _pad2d(params["w3"], H, H)
    b3 = _pad2d(params["b3"], 1, H)
    w4 = _pad2d(params["w4"], H, M)
    b4 = _pad2d(params["b4"], 1, M)

    grid = (Bp // TB,)

    xo_spec = pl.BlockSpec((TB, M), lambda i: (i, 0))          # streamed per grid step

    def resident(shape):                                       # stays in VMEM all steps
        return pl.BlockSpec(shape, lambda i: (0, 0))

    # VMEM budget: double-buffered x + out tiles, weights/biases, intermediate
    # activations, plus margin. Clamp into a range safe on v5e/v6e/v7x.
    tile_bytes = TB * M * 4
    weight_bytes = (M * H + H * H + H * H + H * M + 3 * H + M) * 4
    act_bytes = 3 * TB * H * 4 + TB * M * 4
    vmem_limit = int(min(100 * 2**20,
                         max(32 * 2**20,
                             4 * tile_bytes + 2 * weight_bytes + act_bytes + 2 * 2**20)))

    out = pl.pallas_call(
        sae_kernel,
        out_shape=jax.ShapeDtypeStruct((Bp, M), jnp.float32),
        grid=grid,
        in_specs=[
            xo_spec,
            resident(w1.shape), resident(b1.shape),
            resident(w2.shape), resident(b2.shape),
            resident(w3.shape), resident(b3.shape),
            resident(w4.shape), resident(b4.shape),
        ],
        out_specs=xo_spec,
        compiler_params=pltpu.CompilerParams(
            dimension_semantics=("parallel",),
            vmem_limit_bytes=vmem_limit),
    )(xp, w1, b1, w2, b2, w3, b3, w4, b4)

    return out[:B, :nb_movies]


def init_params(key, nb_movies):
    """Deterministic init mimicking nn.Linear default (uniform +-1/sqrt(fan_in)).
    Weights stored as (in_features, out_features); biases as (1, out_features)."""
    dims = [(nb_movies, 20), (20, 10), (10, 20), (20, nb_movies)]
    params = {}
    for idx, (fan_in, fan_out) in enumerate(dims, start=1):
        key, kw, kb = jax.random.split(key, 3)
        bound = 1.0 / jnp.sqrt(jnp.float32(fan_in))
        params[f"w{idx}"] = jax.random.uniform(
            kw, (fan_in, fan_out), jnp.float32, -bound, bound)
        params[f"b{idx}"] = jax.random.uniform(
            kb, (1, fan_out), jnp.float32, -bound, bound)
    return params


def sae_forward_ref(x, params):
    """Pure-JAX reference for correctness check."""
    h = jax.nn.sigmoid(x @ params["w1"] + params["b1"])
    h = jax.nn.sigmoid(h @ params["w2"] + params["b2"])
    h = jax.nn.sigmoid(h @ params["w3"] + params["b3"])
    return h @ params["w4"] + params["b4"]


if __name__ == "__main__":
    key = jax.random.PRNGKey(0)
    nb_movies = 200   # small synthetic "movies" dimension (pads to 256 lanes)
    batch = 10        # exercises batch padding (10 -> 16 rows)

    kp, kx = jax.random.split(key)
    params = init_params(kp, nb_movies)
    # Ratings-like input: values in [0, 5]
    x = jax.random.uniform(kx, (batch, nb_movies), jnp.float32, 0.0, 5.0)

    out = sae_forward(x, params)
    out = jax.block_until_ready(out)

    ref = sae_forward_ref(x, params)
    assert out.shape == (batch, nb_movies)
    assert jnp.allclose(out, ref, atol=1e-5, rtol=1e-5)

    print("KERNEL_OK")
</pallas_src>

<mosaic_0001>
module attributes {stable_mosaic.version = 11 : i64} {
  func.func @sae_kernel(%arg0: i32, %arg1: memref<16x256xf32, #tpu.memory_space<vmem>>, %arg2: memref<256x128xf32, #tpu.memory_space<vmem>>, %arg3: memref<1x128xf32, #tpu.memory_space<vmem>>, %arg4: memref<128x128xf32, #tpu.memory_space<vmem>>, %arg5: memref<1x128xf32, #tpu.memory_space<vmem>>, %arg6: memref<128x128xf32, #tpu.memory_space<vmem>>, %arg7: memref<1x128xf32, #tpu.memory_space<vmem>>, %arg8: memref<128x256xf32, #tpu.memory_space<vmem>>, %arg9: memref<1x256xf32, #tpu.memory_space<vmem>>, %arg10: memref<16x256xf32, #tpu.memory_space<vmem>>) attributes {dimension_semantics = [#tpu.dimension_semantics<parallel>], iteration_bounds = array<i64: 1>, scalar_prefetch = 0 : i64, scratch_operands = 0 : i64, tpu.core_type = #tpu.core_type<tc>, window_params = [{transform_indices = @transform_0, window_bounds = array<i64: 16, 256>}, {pipeline_mode = #tpu.pipeline_mode<synchronous>, transform_indices = @transform_1, window_bounds = array<i64: 256, 128>}, {pipeline_mode = #tpu.pipeline_mode<synchronous>, transform_indices = @transform_2, window_bounds = array<i64: 1, 128>}, {pipeline_mode = #tpu.pipeline_mode<synchronous>, transform_indices = @transform_3, window_bounds = array<i64: 128, 128>}, {pipeline_mode = #tpu.pipeline_mode<synchronous>, transform_indices = @transform_4, window_bounds = array<i64: 1, 128>}, {pipeline_mode = #tpu.pipeline_mode<synchronous>, transform_indices = @transform_5, window_bounds = array<i64: 128, 128>}, {pipeline_mode = #tpu.pipeline_mode<synchronous>, transform_indices = @transform_6, window_bounds = array<i64: 1, 128>}, {pipeline_mode = #tpu.pipeline_mode<synchronous>, transform_indices = @transform_7, window_bounds = array<i64: 128, 256>}, {pipeline_mode = #tpu.pipeline_mode<synchronous>, transform_indices = @transform_8, window_bounds = array<i64: 1, 256>}, {transform_indices = @transform_9, window_bounds = array<i64: 16, 256>}]} {
    %c0 = arith.constant 0 : index
    %c0_0 = arith.constant 0 : index
    %0 = vector.load %arg1[%c0, %c0_0] : memref<16x256xf32, #tpu.memory_space<vmem>>, vector<16x256xf32>
    %c0_1 = arith.constant 0 : index
    %c0_2 = arith.constant 0 : index
    %1 = vector.load %arg2[%c0_1, %c0_2] : memref<256x128xf32, #tpu.memory_space<vmem>>, vector<256x128xf32>
    %cst = arith.constant dense<0.000000e+00> : vector<16x128xf32>
    %2 = tpu.matmul %0, %1, %cst {dimension_numbers = #tpu.dot_dimension_numbers<[1], [0], [0], [1], [0, 0, 1, 1], [], []>} : vector<16x256xf32>, vector<256x128xf32>, vector<16x128xf32> -> vector<16x128xf32>
    %c0_3 = arith.constant 0 : index
    %c0_4 = arith.constant 0 : index
    %3 = vector.load %arg3[%c0_3, %c0_4] : memref<1x128xf32, #tpu.memory_space<vmem>>, vector<1x128xf32>
    %4 = vector.broadcast %3 : vector<1x128xf32> to vector<16x128xf32>
    %5 = arith.addf %2, %4 : vector<16x128xf32>
    %6 = arith.negf %5 : vector<16x128xf32>
    %7 = math.exp %6 : vector<16x128xf32>
    %cst_5 = arith.constant 1.000000e+00 : f32
    %8 = vector.broadcast %cst_5 : f32 to vector<16x128xf32>
    %9 = arith.addf %8, %7 : vector<16x128xf32>
    %10 = arith.divf %8, %9 : vector<16x128xf32>
    %c0_6 = arith.constant 0 : index
    %c0_7 = arith.constant 0 : index
    %11 = vector.load %arg4[%c0_6, %c0_7] : memref<128x128xf32, #tpu.memory_space<vmem>>, vector<128x128xf32>
    %cst_8 = arith.constant dense<0.000000e+00> : vector<16x128xf32>
    %12 = tpu.matmul %10, %11, %cst_8 {dimension_numbers = #tpu.dot_dimension_numbers<[1], [0], [0], [1], [0, 0, 1, 1], [], []>} : vector<16x128xf32>, vector<128x128xf32>, vector<16x128xf32> -> vector<16x128xf32>
    %c0_9 = arith.constant 0 : index
    %c0_10 = arith.constant 0 : index
    %13 = vector.load %arg5[%c0_9, %c0_10] : memref<1x128xf32, #tpu.memory_space<vmem>>, vector<1x128xf32>
    %14 = vector.broadcast %13 : vector<1x128xf32> to vector<16x128xf32>
    %15 = arith.addf %12, %14 : vector<16x128xf32>
    %16 = arith.negf %15 : vector<16x128xf32>
    %17 = math.exp %16 : vector<16x128xf32>
    %cst_11 = arith.constant 1.000000e+00 : f32
    %18 = vector.broadcast %cst_11 : f32 to vector<16x128xf32>
    %19 = arith.addf %18, %17 : vector<16x128xf32>
    %20 = arith.divf %18, %19 : vector<16x128xf32>
    %c0_12 = arith.constant 0 : index
    %c0_13 = arith.constant 0 : index
    %21 = vector.load %arg6[%c0_12, %c0_13] : memref<128x128xf32, #tpu.memory_space<vmem>>, vector<128x128xf32>
    %cst_14 = arith.constant dense<0.000000e+00> : vector<16x128xf32>
    %22 = tpu.matmul %20, %21, %cst_14 {dimension_numbers = #tpu.dot_dimension_numbers<[1], [0], [0], [1], [0, 0, 1, 1], [], []>} : vector<16x128xf32>, vector<128x128xf32>, vector<16x128xf32> -> vector<16x128xf32>
    %c0_15 = arith.constant 0 : index
    %c0_16 = arith.constant 0 : index
    %23 = vector.load %arg7[%c0_15, %c0_16] : memref<1x128xf32, #tpu.memory_space<vmem>>, vector<1x128xf32>
    %24 = vector.broadcast %23 : vector<1x128xf32> to vector<16x128xf32>
    %25 = arith.addf %22, %24 : vector<16x128xf32>
    %26 = arith.negf %25 : vector<16x128xf32>
    %27 = math.exp %26 : vector<16x128xf32>
    %cst_17 = arith.constant 1.000000e+00 : f32
    %28 = vector.broadcast %cst_17 : f32 to vector<16x128xf32>
    %29 = arith.addf %28, %27 : vector<16x128xf32>
    %30 = arith.divf %28, %29 : vector<16x128xf32>
    %c0_18 = arith.constant 0 : index
    %c0_19 = arith.constant 0 : index
    %31 = vector.load %arg8[%c0_18, %c0_19] : memref<128x256xf32, #tpu.memory_space<vmem>>, vector<128x256xf32>
    %cst_20 = arith.constant dense<0.000000e+00> : vector<16x256xf32>
    %32 = tpu.matmul %30, %31, %cst_20 {dimension_numbers = #tpu.dot_dimension_numbers<[1], [0], [0], [1], [0, 0, 1, 1], [], []>} : vector<16x128xf32>, vector<128x256xf32>, vector<16x256xf32> -> vector<16x256xf32>
    %c0_21 = arith.constant 0 : index
    %c0_22 = arith.constant 0 : index
    %33 = vector.load %arg9[%c0_21, %c0_22] : memref<1x256xf32, #tpu.memory_space<vmem>>, vector<1x256xf32>
    %34 = vector.broadcast %33 : vector<1x256xf32> to vector<16x256xf32>
    %35 = arith.addf %32, %34 : vector<16x256xf32>
    %c0_23 = arith.constant 0 : index
    %c0_24 = arith.constant 0 : index
    %36 = vector.load %arg10[%c0_23, %c0_24] : memref<16x256xf32, #tpu.memory_space<vmem>>, vector<16x256xf32>
    tpu.vector_store %arg10[%c0_23, %c0_24], %35 {strides = array<i32>} : memref<16x256xf32, #tpu.memory_space<vmem>>, vector<16x256xf32>,
    return
  }
  func.func @transform_0(%arg0: i32) -> (i32, i32) {
    %c0_i32 = arith.constant 0 : i32
    %c0_i32_0 = arith.constant 0 : i32
    return %arg0, %c0_i32 : i32, i32
  }
  func.func @transform_1(%arg0: i32) -> (i32, i32) {
    %c0_i32 = arith.constant 0 : i32
    %c0_i32_0 = arith.constant 0 : i32
    %c0_i32_1 = arith.constant 0 : i32
    return %c0_i32, %c0_i32_0 : i32, i32
  }
  func.func @transform_2(%arg0: i32) -> (i32, i32) {
    %c0_i32 = arith.constant 0 : i32
    %c0_i32_0 = arith.constant 0 : i32
    %c0_i32_1 = arith.constant 0 : i32
    return %c0_i32, %c0_i32_0 : i32, i32
  }
  func.func @transform_3(%arg0: i32) -> (i32, i32) {
    %c0_i32 = arith.constant 0 : i32
    %c0_i32_0 = arith.constant 0 : i32
    %c0_i32_1 = arith.constant 0 : i32
    return %c0_i32, %c0_i32_0 : i32, i32
  }
  func.func @transform_4(%arg0: i32) -> (i32, i32) {
    %c0_i32 = arith.constant 0 : i32
    %c0_i32_0 = arith.constant 0 : i32
    %c0_i32_1 = arith.constant 0 : i32
    return %c0_i32, %c0_i32_0 : i32, i32
  }
  func.func @transform_5(%arg0: i32) -> (i32, i32) {
    %c0_i32 = arith.constant 0 : i32
    %c0_i32_0 = arith.constant 0 : i32
    %c0_i32_1 = arith.constant 0 : i32
    return %c0_i32, %c0_i32_0 : i32, i32
  }
  func.func @transform_6(%arg0: i32) -> (i32, i32) {
    %c0_i32 = arith.constant 0 : i32
    %c0_i32_0 = arith.constant 0 : i32
    %c0_i32_1 = arith.constant 0 : i32
    return %c0_i32, %c0_i32_0 : i32, i32
  }
  func.func @transform_7(%arg0: i32) -> (i32, i32) {
    %c0_i32 = arith.constant 0 : i32
    %c0_i32_0 = arith.constant 0 : i32
    %c0_i32_1 = arith.constant 0 : i32
    return %c0_i32, %c0_i32_0 : i32, i32
  }
  func.func @transform_8(%arg0: i32) -> (i32, i32) {
    %c0_i32 = arith.constant 0 : i32
    %c0_i32_0 = arith.constant 0 : i32
    %c0_i32_1 = arith.constant 0 : i32
    return %c0_i32, %c0_i32_0 : i32, i32
  }
  func.func @transform_9(%arg0: i32) -> (i32, i32) {
    %c0_i32 = arith.constant 0 : i32
    %c0_i32_0 = arith.constant 0 : i32
    return %arg0, %c0_i32 : i32, i32
  }
}

</mosaic_0001>

<bundles_post_ra>
// kernel: sae_forward.1
= control target key start
LH: loop header
LB: loop body
LE: loop exit
PB: predicated region body
PF: predicated region fallthrough
CT: control target
= control target key end

     0   :  { %s1235_s0 = inlined_call_operand.vmem [shape: f32[16,256], index: 0, kind: input, shape index: {}]   ;;  %s1236_s1 = inlined_call_operand.vmem [shape: f32[256,128], index: 1, kind: input, shape index: {}]   ;;  %s1237_s2 = inlined_call_operand.vmem [shape: f32[1,128], index: 2, kind: input, shape index: {}]   ;;  %s1238_s3 = inlined_call_operand.vmem [shape: f32[128,128], index: 3, kind: input, shape index: {}]   ;;  %s1239_s4 = inlined_call_operand.vmem [shape: f32[1,128], index: 4, kind: input, shape index: {}]   ;;  %s1240_s5 = inlined_call_operand.vmem [shape: f32[128,128], index: 5, kind: input, shape index: {}]   ;;  %s1241_s6 = inlined_call_operand.vmem [shape: f32[1,128], index: 6, kind: input, shape index: {}]   ;;  %s1242_s7 = inlined_call_operand.vmem [shape: f32[128,256], index: 7, kind: input, shape index: {}]   ;;  %s1243_s8 = inlined_call_operand.vmem [shape: f32[1,256], index: 8, kind: input, shape index: {}]   ;;  %s1244_s9 = inlined_call_operand.hbm [shape: f32[16,256], index: 9, kind: output, shape index: {}]  }
   0x1   :  { %v53_v0 = vld [vmem:[%s1236_s1 + $0x80] sm:$0xff]  ;;  %v54_v1 = vld [vmem:[%s1236_s1 + $0x88] sm:$0xff]  ;;  %v55_v5 = vld [vmem:[%s1236_s1 + $0x90] sm:$0xff] }
   0x2   :  { %v37_v2 = vld [vmem:[%s1236_s1] sm:$0xff]  ;;  %v677_v3 = vpack.c.bf16 %v54_v1, %v53_v0  ;;  %v38_v4 = vld [vmem:[%s1236_s1 + $0x8] sm:$0xff]  ;;  %v56_v6 = vld [vmem:[%s1236_s1 + $0x98] sm:$0xff] }
   0x3   :  { %v679_v7 = vpack.c.bf16 %v38_v4, %v37_v2  ;;  %v681_v8 = vpack.c.bf16 %v56_v6, %v55_v5  ;;  %v39_v9 = vld [vmem:[%s1236_s1 + $0x10] sm:$0xff]  ;;  %v40_v10 = vld [vmem:[%s1236_s1 + $0x18] sm:$0xff]  ;;  %v57_v11 = vld [vmem:[%s1236_s1 + $0xa0] sm:$0xff] }
   0x4   :  { %678 = vmatprep.subr.bf16.mxu0 %v677_v3  ;;  %v58_v12 = vld [vmem:[%s1236_s1 + $0xa8] sm:$0xff]  ;;  %v683_v13 = vpack.c.bf16 %v40_v10, %v39_v9  ;;  %v41_v15 = vld [vmem:[%s1236_s1 + $0x20] sm:$0xff]  ;;  %v59_v17 = vld [vmem:[%s1236_s1 + $0xb0] sm:$0xff] }
   0x5   :  { %680 = vmatpush3.bf16.msra.mxu0 %v679_v7  ;;  %v685_v14 = vpack.c.bf16 %v58_v12, %v57_v11  ;;  %v42_v16 = vld [vmem:[%s1236_s1 + $0x28] sm:$0xff]  ;;  %v60_v18 = vld [vmem:[%s1236_s1 + $0xb8] sm:$0xff]  ;;  %v43_v21 = vld [vmem:[%s1236_s1 + $0x30] sm:$0xff] }
   0x6   :  { %682 = vmatprep.subr.bf16.mxu0 %v681_v8  ;;  %v687_v19 = vpack.c.bf16 %v42_v16, %v41_v15  ;;  %v689_v20 = vpack.c.bf16 %v60_v18, %v59_v17  ;;  %v44_v22 = vld [vmem:[%s1236_s1 + $0x38] sm:$0xff]  ;;  %v61_v23 = vld [vmem:[%s1236_s1 + $0xc0] sm:$0xff]  ;;  %v62_v24 = vld [vmem:[%s1236_s1 + $0xc8] sm:$0xff] }
   0x7   :  { %v34_v25 = vld [vmem:[%s1235_s0 + $0x8] sm:$0xff]  ;;  %v691_v26 = vpack.c.bf16 %v44_v22, %v43_v21 }
   0x8   :  { %140 = vmatprep.mubr.f32.mxu0 %v34_v25 }
   0x9   :  { %684 = vmatpush3.bf16.msra.mxu0 %v683_v13 }
   0xa   :  { %686 = vmatprep.subr.bf16.mxu0 %v685_v14 }
   0xd   :  { %688 = vmatpush3.bf16.msra.mxu0 %v687_v19 }
   0xe   :  { %14 = vsyncpa [#allocation3], 0  ;;  %690 = vmatprep.subr.bf16.mxu0 %v689_v20  ;;  %v693_v27 = vpack.c.bf16 %v62_v24, %v61_v23  ;;  %v45_v28 = vld [vmem:[%s1236_s1 + $0x40] sm:$0xff]  ;;  %v46_v29 = vld [vmem:[%s1236_s1 + $0x48] sm:$0xff]  ;;  %s858_s22 = smov [#allocation2]  }
   0xf   :  { %v63_v30 = vld [vmem:[%s1236_s1 + $0xd0] sm:$0xff]  ;;  %v64_v31 = vld [vmem:[%s1236_s1 + $0xd8] sm:$0xff]  ;;  %v695_v32 = vpack.c.bf16 %v46_v29, %v45_v28  ;;  %v65_v36 = vld [vmem:[%s1236_s1 + $0xe0] sm:$0xff]  ;;  %s513_s23 = sshll.u32 %s858_s22, 4  ;;  %s514_s23 = int_to_ptr.vmem [resolvable:$true] %s513_s23 }
  0x10   :  { %v697_v33 = vpack.c.bf16 %v64_v31, %v63_v30  ;;  %v47_v34 = vld [vmem:[%s1236_s1 + $0x50] sm:$0xff]  ;;  %v48_v35 = vld [vmem:[%s1236_s1 + $0x58] sm:$0xff]  ;;  %v66_v37 = vld [vmem:[%s1236_s1 + $0xe8] sm:$0xff]  ;;  %s833_s24 = scalar_lea.vmem %s514_s23, 512  ;;  %p838_p1 = scmp.lt.s32.totalorder %s514_s23, %s514_s23 }
  0x11   :  { %692 = vmatpush3.bf16.msra.mxu0 %v691_v26  ;;  %v699_v38 = vpack.c.bf16 %v48_v35, %v47_v34  ;;  %v701_v39 = vpack.c.bf16 %v66_v37, %v65_v36  ;;  %v49_v40 = vld [vmem:[%s1236_s1 + $0x60] sm:$0xff]  ;;  %v50_v41 = vld [vmem:[%s1236_s1 + $0x68] sm:$0xff]  ;;  %v67_v42 = vld [vmem:[%s1236_s1 + $0xf0] sm:$0xff]  ;;  %p834_p0 = scmp.ne.s32.totalorder %s514_s23, %s833_s24  ;;  %p839_p2 = scmp.lt.s32.totalorder %s833_s24, %s833_s24 }
  0x12   :  { %694 = vmatprep.subr.bf16.mxu0 %v693_v27  ;;  %v68_v43 = vld [vmem:[%s1236_s1 + $0xf8] sm:$0xff]  ;;  %v703_v44 = vpack.c.bf16 %v50_v41, %v49_v40  ;;  %v51_v46 = vld [vmem:[%s1236_s1 + $0x70] sm:$0xff]  ;;  %v33_v49 = vld [vmem:[%s1235_s0] sm:$0xff] }
  0x13   :  { %v705_v45 = vpack.c.bf16 %v68_v43, %v67_v42  ;;  %v52_v47 = vld [vmem:[%s1236_s1 + $0x78] sm:$0xff]  ;;  %v35_v51 = vld [vmem:[%s1235_s0 + $0x10] sm:$0xff]  ;;  %v163_v52 = vld [vmem:[%s1238_s3] sm:$0xff]  ;;  %p840_p3 = por %p839_p2, %p838_p1 }
  0x14   :  { %v707_v48 = vpack.c.bf16 %v52_v47, %v51_v46  ;;  %v36_v50 = vld [vmem:[%s1235_s0 + $0x18] sm:$0xff]  ;;  %v164_v53 = vld [vmem:[%s1238_s3 + $0x8] sm:$0xff]  ;;  %v165_v55 = vld [vmem:[%s1238_s3 + $0x10] sm:$0xff] }
  0x15   :  { %696 = vmatpush3.bf16.msra.mxu0 %v695_v32  ;;  %v709_v54 = vpack.c.bf16 %v164_v53, %v163_v52  ;;  %v166_v56 = vld [vmem:[%s1238_s3 + $0x18] sm:$0xff]  ;;  %v167_v58 = vld [vmem:[%s1238_s3 + $0x20] sm:$0xff]  ;;  %v168_v59 = vld [vmem:[%s1238_s3 + $0x28] sm:$0xff]  ;;  %p841_p4 = pnand %p840_p3, %p834_p0 }
  0x16   :  { %698 = vmatprep.subr.bf16.mxu0 %v697_v33  ;;  %v713_v57 = vpack.c.bf16 %v166_v56, %v165_v55  ;;  %v717_v60 = vpack.c.bf16 %v168_v59, %v167_v58  ;;  %v169_v61 = vld [vmem:[%s1238_s3 + $0x30] sm:$0xff]  ;;  %v170_v62 = vld [vmem:[%s1238_s3 + $0x38] sm:$0xff]  ;;  %v171_v0 = vld [vmem:[%s1238_s3 + $0x40] sm:$0xff] }
  0x17   :  { %710 = vmatprep.subr.bf16.mxu1 %v709_v54  ;;  %v721_v63 = vpack.c.bf16 %v170_v62, %v169_v61  ;;  %v172_v1 = vld [vmem:[%s1238_s3 + $0x48] sm:$0xff]  ;;  %v173_v3 = vld [vmem:[%s1238_s3 + $0x50] sm:$0xff]  ;;  %v174_v4 = vld [vmem:[%s1238_s3 + $0x58] sm:$0xff] }
  0x18   :  { %712 = vmatpush3.bf16.msra.mxu1 %v709_v54  ;;  %v725_v2 = vpack.c.bf16 %v172_v1, %v171_v0  ;;  %v729_v5 = vpack.c.bf16 %v174_v4, %v173_v3  ;;  %v175_v6 = vld [vmem:[%s1238_s3 + $0x60] sm:$0xff]  ;;  %v176_v7 = vld [vmem:[%s1238_s3 + $0x68] sm:$0xff]  ;;  %v177_v8 = vld [vmem:[%s1238_s3 + $0x70] sm:$0xff] }
  0x19   :  { %700 = vmatpush3.bf16.msra.mxu0 %v699_v38  ;;  %714 = vmatprep.subr.bf16.mxu1 %v713_v57  ;;  %v733_v9 = vpack.c.bf16 %v176_v7, %v175_v6  ;;  %v178_v10 = vld [vmem:[%s1238_s3 + $0x78] sm:$0xff]  ;;  %v273_v12 = vld [vmem:[%s1240_s5] sm:$0xff]  ;;  %v274_v13 = vld [vmem:[%s1240_s5 + $0x8] sm:$0xff] }
  0x1a   :  { %702 = vmatprep.subr.bf16.mxu0 %v701_v39  ;;  %v737_v11 = vpack.c.bf16 %v178_v10, %v177_v8  ;;  %v741_v14 = vpack.c.bf16 %v274_v13, %v273_v12  ;;  %v524_v16 = vld [vmem:[%s1237_s2] ss:$0 sm:$0xff]  ;;  %v275_v32 = vld [vmem:[%s1240_s5 + $0x10] sm:$0xff]  ;;  %v276_v33 = vld [vmem:[%s1240_s5 + $0x18] sm:$0xff] }
  0x1b   :  { %v745_v34 = vpack.c.bf16 %v276_v33, %v275_v32  ;;  %v277_v35 = vld [vmem:[%s1240_s5 + $0x20] sm:$0xff]  ;;  %v278_v36 = vld [vmem:[%s1240_s5 + $0x28] sm:$0xff]  ;;  %v279_v38 = vld [vmem:[%s1240_s5 + $0x30] sm:$0xff] }
  0x1c   :  { %716 = vmatpush3.bf16.msra.mxu1 %v713_v57  ;;  %v749_v37 = vpack.c.bf16 %v278_v36, %v277_v35  ;;  %v280_v39 = vld [vmem:[%s1240_s5 + $0x38] sm:$0xff]  ;;  %v281_v41 = vld [vmem:[%s1240_s5 + $0x40] sm:$0xff]  ;;  %v282_v42 = vld [vmem:[%s1240_s5 + $0x48] sm:$0xff] }
  0x1d   :  { %704 = vmatpush3.bf16.msra.mxu0 %v703_v44  ;;  %718 = vmatprep.subr.bf16.mxu1 %v717_v60  ;;  %v753_v40 = vpack.c.bf16 %v280_v39, %v279_v38  ;;  %v757_v43 = vpack.c.bf16 %v282_v42, %v281_v41  ;;  %v283_v44 = vld [vmem:[%s1240_s5 + $0x50] sm:$0xff]  ;;  %v285_v47 = vld [vmem:[%s1240_s5 + $0x60] sm:$0xff]  ;;  %v384_v53 = vld [vmem:[%s1242_s7 + $0x8] sm:$0xff] }
  0x1e   :  { %706 = vmatprep.subr.bf16.mxu0 %v705_v45  ;;  %v284_v45 = vld [vmem:[%s1240_s5 + $0x58] sm:$0xff]  ;;  %v383_v55 = vld [vmem:[%s1242_s7] sm:$0xff]  ;;  %v385_v57 = vld [vmem:[%s1242_s7 + $0x10] sm:$0xff] }
  0x1f   :  { %v761_v46 = vpack.c.bf16 %v284_v45, %v283_v44  ;;  %v386_v54 = vld [vmem:[%s1242_s7 + $0x18] sm:$0xff]  ;;  %v775_v58 = vpack.c.bf16 %v385_v57, %v383_v55  ;;  %v527_v59 = vld [vmem:[%s1239_s4] ss:$0 sm:$0xff]  ;;  %v388_v8 = vld [vmem:[%s1242_s7 + $0x28] sm:$0xff]  ;;  %v857_v45 = vmov 0.0  }
  0x20   :  { %720 = vmatpush3.bf16.msra.mxu1 %v717_v60  ;;  %v773_v56 = vpack.c.bf16 %v386_v54, %v384_v53  ;;  %v389_v12 = vld [vmem:[%s1242_s7 + $0x30] sm:$0xff]  ;;  %v404_v32 = vld [vmem:[%s1242_s7 + $0xa8] sm:$0xff]  ;;  %v406_v33 = vld [vmem:[%s1242_s7 + $0xb8] sm:$0xff] }
  0x21   :  { %708 = vmatpush3.bf16.msra.mxu0 %v707_v48  ;;  %722 = vmatprep.subr.bf16.mxu1 %v721_v63  ;;  %v286_v48 = vld [vmem:[%s1240_s5 + $0x68] sm:$0xff]  ;;  %v403_v35 = vld [vmem:[%s1242_s7 + $0xa0] sm:$0xff]  ;;  %v405_v36 = vld [vmem:[%s1242_s7 + $0xb0] sm:$0xff] }
  0x22   :  { %742 = vmatprep.subr.bf16.mxu0 %v741_v14  ;;  %v408_v38 = vld [vmem:[%s1242_s7 + $0xc8] sm:$0xff]  ;;  %v410_v39 = vld [vmem:[%s1242_s7 + $0xd8] sm:$0xff]  ;;  %v409_v42 = vld [vmem:[%s1242_s7 + $0xd0] sm:$0xff] }
  0x23   :  { %v797_v41 = vpack.c.bf16 %v410_v39, %v408_v38  ;;  %v414_v44 = vld [vmem:[%s1242_s7 + $0xf8] sm:$0xff] }
  0x24   :  { %141 = vmatmul.mubr.f32.vlgmr.msra.gmra.mrb[0].mxu0 %v33_v49  ;;  %724 = vmatpush3.bf16.msra.mxu1 %v721_v63  ;;  %v287_v49 = vld [vmem:[%s1240_s5 + $0x70] sm:$0xff] }
  0x25   :  { %145 = vmatprep.mubr.f32.mxu0 %v36_v50  ;;  %726 = vmatprep.subr.bf16.mxu1 %v725_v2  ;;  %v765_v50 = vpack.c.bf16 %v286_v48, %v285_v47  ;;  %v411_v48 = vld [vmem:[%s1242_s7 + $0xe0] sm:$0xff] }
  0x26   :  { %744 = vmatpush3.bf16.msra.mxu0 %v741_v14  ;;  %v392_v14 = vld [vmem:[%s1242_s7 + $0x48] sm:$0xff] }
  0x27   :  { %746 = vmatprep.subr.bf16.mxu0 %v745_v34 }
  0x28   :  { %146 = vmatmul.mubr.f32.gmra.mrb[2].mxu0 %v35_v51  ;;  %728 = vmatpush3.bf16.msra.mxu1 %v725_v2  ;;  %v288_v51 = vld [vmem:[%s1240_s5 + $0x78] sm:$0xff] }
  0x29   :  { %730 = vmatprep.subr.bf16.mxu1 %v729_v5  ;;  %v769_v52 = vpack.c.bf16 %v288_v51, %v287_v49  ;;  %v413_v49 = vld [vmem:[%s1242_s7 + $0xf0] sm:$0xff]  ;;  %v530_v51 = vld [vmem:[%s1241_s6] ss:$0 sm:$0xff] }
  0x2a   :  { %748 = vmatpush3.bf16.msra.mxu0 %v745_v34  ;;  %v793_v34 = vpack.c.bf16 %v406_v33, %v404_v32 }
  0x2b   :  { %750 = vmatprep.subr.bf16.mxu0 %v749_v37 }
  0x2c   :  { %732 = vmatpush3.bf16.msra.mxu1 %v729_v5 }
  0x2d   :  { %734 = vmatprep.subr.bf16.mxu1 %v733_v9 }
  0x2e   :  { %752 = vmatpush3.bf16.msra.mxu0 %v749_v37  ;;  %v795_v37 = vpack.c.bf16 %v405_v36, %v403_v35 }
  0x2f   :  { %754 = vmatprep.subr.bf16.mxu0 %v753_v40 }
  0x30   :  { %736 = vmatpush3.bf16.msra.mxu1 %v733_v9  ;;  %v390_v9 = vld [vmem:[%s1242_s7 + $0x38] sm:$0xff] }
  0x31   :  { %738 = vmatprep.subr.bf16.mxu1 %v737_v11  ;;  %v777_v10 = vpack.c.bf16 %v390_v9, %v388_v8 }
  0x32   :  { %756 = vmatpush3.bf16.msra.mxu0 %v753_v40  ;;  %v407_v40 = vld [vmem:[%s1242_s7 + $0xc0] sm:$0xff] }
  0x33   :  { %758 = vmatprep.subr.bf16.mxu0 %v757_v43 }
  0x34   :  { %740 = vmatpush3.bf16.msra.mxu1 %v737_v11  ;;  %v387_v11 = vld [vmem:[%s1242_s7 + $0x20] sm:$0xff] }
  0x35   :  { %774 = vmatprep.subr.bf16.mxu1 %v773_v56  ;;  %v779_v13 = vpack.c.bf16 %v389_v12, %v387_v11 }
  0x36   :  { %760 = vmatpush3.bf16.msra.mxu0 %v757_v43  ;;  %v412_v43 = vld [vmem:[%s1242_s7 + $0xe8] sm:$0xff] }
  0x37   :  { %762 = vmatprep.subr.bf16.mxu0 %v761_v46  ;;  %v801_v47 = vpack.c.bf16 %v414_v44, %v412_v43 }
  0x3a   :  { %764 = vmatpush3.bf16.msra.mxu0 %v761_v46  ;;  %v799_v46 = vpack.c.bf16 %v409_v42, %v407_v40 }
  0x3b   :  { %766 = vmatprep.subr.bf16.mxu0 %v765_v50 }
  0x3e   :  { %768 = vmatpush3.bf16.msra.mxu0 %v765_v50  ;;  %v803_v50 = vpack.c.bf16 %v413_v49, %v411_v48 }
  0x3f   :  { %770 = vmatprep.subr.bf16.mxu0 %v769_v52 }
  0x42   :  { %772 = vmatpush3.bf16.msra.mxu0 %v769_v52 }
  0xf7   :  { %v565_v15 = vpop.f32.mrb[0].mxu0 }
  0xf8   :  { %v566_v17 = vpop.f32.mrb[1].mxu0 }
  0xf9   :  { %v567_v18 = vadd.f32 %v566_v17, %v565_v15  ;;  %v394_v15 = vld [vmem:[%s1242_s7 + $0x58] sm:$0xff]  ;;  %v391_v17 = vld [vmem:[%s1242_s7 + $0x40] sm:$0xff] }
  0xfb   :  { %v143_v19 = vadd.f32 %v567_v18, %v524_v16  ;;  %v568_v20 = vpop.f32.mrb[2].mxu0  ;;  %v393_v18 = vld [vmem:[%s1242_s7 + $0x50] sm:$0xff] }
  0xfc   :  { %v569_v21 = vpop.f32.mrb[3].mxu0 }
  0xfd   :  { %v525_v22 = vmul.f32 -1.442695, %v143_v19  ;;  %v570_v23 = vadd.f32 %v569_v21, %v568_v20  ;;  %v783_v19 = vpack.c.bf16 %v393_v18, %v391_v17  ;;  %v396_v20 = vld [vmem:[%s1242_s7 + $0x68] sm:$0xff]  ;;  %v398_v21 = vld [vmem:[%s1242_s7 + $0x78] sm:$0xff] }
  0xff   :  { %809 = vpow2.f32 %v525_v22  ;;  %v148_v24 = vadd.f32 %v570_v23, %v524_v16  ;;  %v781_v16 = vpack.c.bf16 %v394_v15, %v392_v14  ;;  %v785_v22 = vpack.c.bf16 %v398_v21, %v396_v20  ;;  %v395_v23 = vld [vmem:[%s1242_s7 + $0x60] sm:$0xff] }
 0x101   :  { %v526_v25 = vmul.f32 -1.442695, %v148_v24  ;;  %v397_v24 = vld [vmem:[%s1242_s7 + $0x70] sm:$0xff] }
 0x103   :  { %811 = vpow2.f32 %v526_v25  ;;  %v787_v25 = vpack.c.bf16 %v397_v24, %v395_v23 }
 0x109   :  { %v810_v26 = vpop.eup %809 }
 0x10a   :  { %v157_v27 = vadd.f32 1.0, %v810_v26  ;;  %v400_v26 = vld [vmem:[%s1242_s7 + $0x88] sm:$0xff] }
 0x10c   :  { %813 = vrcp.f32 %v157_v27  ;;  %v402_v27 = vld [vmem:[%s1242_s7 + $0x98] sm:$0xff] }
 0x10d   :  { %v812_v28 = vpop.eup %811 }
 0x10e   :  { %v158_v29 = vadd.f32 1.0, %v812_v28  ;;  %v789_v28 = vpack.c.bf16 %v402_v27, %v400_v26 }
 0x110   :  { %815 = vrcp.f32 %v158_v29  ;;  %v399_v29 = vld [vmem:[%s1242_s7 + $0x80] sm:$0xff] }
 0x116   :  { %v814_v30 = vpop.eup %813 }
 0x117   :  { %639 = vmatprep.mubr.f32.mxu1 %v814_v30  ;;  %v401_v30 = vld [vmem:[%s1242_s7 + $0x90] sm:$0xff] }
 0x11a   :  { %v816_v31 = vpop.eup %815 }
 0x11b   :  { %640 = vmatmul.mubr.f32.vlgmr.msra.gmra.mrb[0].mxu1 %v816_v31  ;;  %v791_v31 = vpack.c.bf16 %v401_v30, %v399_v29 }
 0x11c   :  { %776 = vmatpush1.bf16.msra.mxu1 %v775_v58  ;;  %491 = vmatprep.mubr.f32.mxu1 %v857_v45 }
 0x11d   :  { %778 = vmatprep.subr.bf16.mxu1 %v777_v10 }
 0x120   :  { %780 = vmatpush1.bf16.msra.mxu1 %v779_v13 }
 0x121   :  { %782 = vmatprep.subr.bf16.mxu1 %v781_v16 }
 0x124   :  { %784 = vmatpush1.bf16.msra.mxu1 %v783_v19 }
 0x125   :  { %786 = vmatprep.subr.bf16.mxu1 %v785_v22 }
 0x128   :  { %788 = vmatpush1.bf16.msra.mxu1 %v787_v25 }
 0x129   :  { %790 = vmatprep.subr.bf16.mxu1 %v789_v28 }
 0x12c   :  { %792 = vmatpush1.bf16.msra.mxu1 %v791_v31 }
 0x12d   :  { %794 = vmatprep.subr.bf16.mxu1 %v793_v34 }
 0x130   :  { %796 = vmatpush1.bf16.msra.mxu1 %v795_v37 }
 0x131   :  { %798 = vmatprep.subr.bf16.mxu1 %v797_v41 }
 0x134   :  { %800 = vmatpush1.bf16.msra.mxu1 %v799_v46 }
 0x135   :  { %802 = vmatprep.subr.bf16.mxu1 %v801_v47 }
 0x138   :  { %804 = vmatpush1.bf16.msra.mxu1 %v803_v50 }
 0x1ee   :  { %v641_v60 = vpop.f32.mrb[0].mxu1 }
 0x1ef   :  { %v258_v61 = vadd.f32 %v641_v60, %v527_v59  ;;  %v252_v62 = vpop.f32.mrb[1].mxu1 }
 0x1f0   :  { %v253_v63 = vadd.f32 %v527_v59, %v252_v62 }
 0x1f1   :  { %v529_v0 = vmul.f32 -1.442695, %v258_v61 }
 0x1f2   :  { %v528_v1 = vmul.f32 -1.442695, %v253_v63 }
 0x1f3   :  { %817 = vpow2.f32 %v529_v0  ;;  %v417_v0 = vlaneseq }
 0x1f4   :  { %819 = vpow2.f32 %v528_v1 }
 0x1f5   :  { %v418_v1 = vshrl.u32 %v417_v0, 7 }
 0x1fd   :  { %v818_v2 = vpop.eup %817 }
 0x1fe   :  { %v820_v3 = vpop.eup %819  ;;  %v268_v4 = vadd.f32 1.0, %v818_v2  ;;  %v419_v2 = vsub.s32 0, %v418_v1 }
 0x1ff   :  { %v267_v5 = vadd.f32 1.0, %v820_v3  ;;  %v415_v3 = vld [vmem:[%s1243_s8] sm:$0x3] }
 0x201   :  { %821 = vrcp.f32 %v267_v5  ;;  %v420_v5 = vrot.slane %v415_v3, %v419_v2 }
 0x202   :  { %823 = vrcp.f32 %v268_v4  ;;  %v423_v4 = vsub.s32 1, %v418_v1 }
 0x20b   :  { %v822_v6 = vpop.eup %821 }
 0x20c   :  { %v824_v7 = vpop.eup %823  ;;  %674 = vmatprep.mubr.f32.mxu0 %v822_v6  ;;  %v424_v6 = vrot.slane %v415_v3, %v423_v4 }
 0x20d   :  { %675 = vmatmul.mubr.f32.vlgmr.msra.gmra.mrb[4].mxu0 %v824_v7 }
 0x2e0   :  { %v676_v52 = vpop.f32.mrb[4].mxu0 }
 0x2e1   :  { %v368_v53 = vadd.f32 %v676_v52, %v530_v51  ;;  %v362_v54 = vpop.f32.mrb[5].mxu0 }
 0x2e2   :  { %v363_v55 = vadd.f32 %v530_v51, %v362_v54 }
 0x2e3   :  { %v532_v56 = vmul.f32 -1.442695, %v368_v53 }
 0x2e4   :  { %v531_v57 = vmul.f32 -1.442695, %v363_v55 }
 0x2e5   :  { %825 = vpow2.f32 %v532_v56 }
 0x2e6   :  { %827 = vpow2.f32 %v531_v57 }
 0x2ef   :  { %v826_v58 = vpop.eup %825 }
 0x2f0   :  { %v828_v59 = vpop.eup %827  ;;  %v378_v61 = vadd.f32 1.0, %v826_v58 }
 0x2f1   :  { %v377_v60 = vadd.f32 1.0, %v828_v59 }
 0x2f3   :  { %829 = vrcp.f32 %v377_v60 }
 0x2f4   :  { %831 = vrcp.f32 %v378_v61 }
 0x2fd   :  { %v830_v62 = vpop.eup %829 }
 0x2fe   :  { %492 = vmatmul.mubr.f32.vlgmr.msra.gmra.mrb[2].mxu1 %v830_v62  ;;  %v832_v63 = vpop.eup %831 }
 0x2ff   :  { %497 = vmatprep.mubr.f32.mxu1 %v857_v45 }
 0x302   :  { %498 = vmatmul.mubr.f32.gmra.mrb[4].mxu1 %v832_v63 }
 0x3d1   :  { %v493_v7 = vpop.f32.mrb[2].mxu1 }
 0x3d2   :  { %v494_v8 = vadd.f32 %v493_v7, %v420_v5  ;;  %v495_v9 = vpop.f32.mrb[3].mxu1 }
 0x3d3   :  { %v496_v10 = vadd.f32 %v495_v9, %v424_v6 }
 0x3d4   :  { %504 = vst [vmem:[#allocation2] sm:$0xff] %v494_v8 }
 0x3d5   :  { %505 = vst [vmem:[#allocation2 + $0x8] sm:$0xff] %v496_v10  ;;  %v499_v11 = vpop.f32.mrb[4].mxu1 }
 0x3d6   :  { %v500_v12 = vadd.f32 %v499_v11, %v420_v5  ;;  %v501_v13 = vpop.f32.mrb[5].mxu1 }
 0x3d7   :  { %v502_v14 = vadd.f32 %v501_v13, %v424_v6 }
 0x3d8   :  { %506 = vst [vmem:[#allocation2 + $0x10] sm:$0xff] %v500_v12 }
 0x3d9   :  { %507 = vst [vmem:[#allocation2 + $0x18] sm:$0xff] %v502_v14 }
 0x3da   :  { %844 = shalt.err (!%p841_p4)
}
 0x3db   :  { %s845_s25 = scalar_lea.hbm %s1244_s9, 512 }
 0x3dc   :  { %p846_p5 = scmp.ne.s32.totalorder %s1244_s9, %s845_s25  ;;  %p849_p6 = scmp.lt.u32.totalorder %s845_s25, %s1244_s9 }
 0x3de   :  { %p851_p7 = pnand %p849_p6, %p846_p5 }
 0x3e0   :  { %854 = shalt.err (!%p851_p7)
}
 0x3e1   :  { %s859_s30 = smov 256   ;;  %s860_s2 = smov 16  }
 0x3e2   :  { %519 = dma.vmem_to_hbm [thread:$0]  %s514_s23, 512, %s1244_s9, [#allocation3], %s859_s30, %s859_s30, %s860_s2  }
 0x3e3   :  { %855 = dma.done.wait [#allocation3], 512  }
 0x3e4   :  { %856 = vsyncadd [#allocation3], 4294966784 }
 0x3e5   :  { %523 = vsyncpa [#allocation3], 1 }

</bundles_post_ra>
